<compile_context>
chip_gen: v7x
topology: tpu7x:2x2x1
jax: 0.10.0
libtpu: 0.0.40
codegen_flags: <defaults>
</compile_context>

<pallas_src>
import jax
import jax.numpy as jnp
from jax.experimental import pallas as pl
from jax.experimental.pallas import tpu as pltpu

N_DELTA_HID_DIM = 20
N_EMB_DIM = 20
N_SYMBOL = 26
N_HID = N_EMB_DIM + N_DELTA_HID_DIM      # 40
OH_PAD = 32                              # one-hot classes padded to sublane multiple
OUT_PAD = 32                             # output classes padded to sublane multiple
K_FIRST = OH_PAD + N_HID                 # 72: merged first-layer contraction dim
W_PACK_ROWS = 2 * N_HID + OUT_PAD        # 112
B_PACK_ROWS = 4 * N_HID + OUT_PAD        # 192
NEG_BIG = -1e30                          # softmax pad (exp underflows to exactly 0)


def _cdiv(a, b):
    return (a + b - 1) // b


def _round_up(x, m):
    return _cdiv(x, m) * m


def _net_kernel(
    cidx_ref,    # (1, bm)   int32  symbol indices (batch on lanes)
    delta_ref,   # (1, bm)   f32
    w_ref,       # (112, 72) f32 packed weights:
                 #   rows   0: 40  W_first (40,72) = [ A=(emb@W0^T[:20])^T | W0_delta^T pad ]
                 #   rows  40: 80  W1^T  (lanes 0:40 real)
                 #   rows  80:112  Wout^T padded to 32 class rows (lanes 0:40 real)
    b_ref,       # (192, 1)  f32 packed bias columns:
                 #   rows   0: 40 delta W (20 real), 40: 80 delta b (20 real),
                 #   rows  80:120 t0 bias, 120:160 t1 bias,
                 #   rows 160:192 out bias (26 real, rows 26:32 = -1e30)
    out_ref,     # (26, bm)  f32 log-probabilities (batch on lanes)
):
    f32 = jnp.float32
    bm = cidx_ref.shape[1]

    # --- one-hot of the symbol index, classes along sublanes ----------------
    cls_iota = jax.lax.broadcasted_iota(jnp.int32, (OH_PAD, bm), 0)
    onehot = (cls_iota == cidx_ref[...]).astype(f32)                  # (32, bm)

    # --- delta dense + relu on the VPU (rank-1, no MXU needed) --------------
    dw = b_ref[0:N_HID, :]                                            # (40, 1)
    db = b_ref[N_HID:2 * N_HID, :]                                    # (40, 1)
    row_iota = jax.lax.broadcasted_iota(jnp.int32, (N_HID, bm), 0)
    delta_pre = dw * delta_ref[...] + db                              # (40, bm)
    delta_out = jnp.where(row_iota < N_DELTA_HID_DIM,
                          jnp.maximum(delta_pre, 0.0), 0.0)           # pad rows exact 0

    # --- merged first layer: one K=72 MXU dot for emb-fold + delta half -----
    x0 = jnp.concatenate([onehot, delta_out], axis=0)                 # (72, bm)
    h = jnp.dot(w_ref[0:N_HID, :], x0, preferred_element_type=f32)    # (40, bm)
    h = jnp.maximum(h + b_ref[2 * N_HID:3 * N_HID, :], 0.0)

    # --- transform1 ----------------------------------------------------------
    h = jnp.dot(w_ref[N_HID:2 * N_HID, 0:N_HID], h,
                preferred_element_type=f32)                           # (40, bm)
    h = jnp.maximum(h + b_ref[3 * N_HID:4 * N_HID, :], 0.0)

    # --- output projection: 26 real class rows padded to 32 -----------------
    logits = jnp.dot(w_ref[2 * N_HID:2 * N_HID + OUT_PAD, 0:N_HID], h,
                     preferred_element_type=f32)                      # (32, bm)
    logits = logits + b_ref[4 * N_HID:4 * N_HID + OUT_PAD, :]         # pad rows = -1e30

    # --- log_softmax along the class (sublane) axis on the uniform tile -----
    m = jnp.max(logits, axis=0, keepdims=True)                        # (1, bm)
    shifted = logits - m
    lse = jnp.log(jnp.sum(jnp.exp(shifted), axis=0, keepdims=True))   # pad rows add 0
    out_ref[...] = shifted[:N_SYMBOL, :] - lse


def init_params(key):
    """Deterministic, PyTorch-default-like (uniform) initialization."""
    ks = jax.random.split(key, 10)

    def lin(kw, kb, fan_in, fan_out):
        bound = 1.0 / jnp.sqrt(jnp.float32(fan_in))
        w = jax.random.uniform(kw, (fan_in, fan_out), jnp.float32, -bound, bound)  # W^T layout
        b = jax.random.uniform(kb, (1, fan_out), jnp.float32, -bound, bound)
        return w, b

    emb = jax.random.normal(ks[0], (N_SYMBOL, N_EMB_DIM), jnp.float32)
    dw, db = lin(ks[1], ks[2], 1, N_DELTA_HID_DIM)
    t0w, t0b = lin(ks[3], ks[4], N_HID, N_HID)
    t1w, t1b = lin(ks[5], ks[6], N_HID, N_HID)
    ow, ob = lin(ks[7], ks[8], N_HID, N_SYMBOL)
    return dict(emb=emb, dw=dw, db=db, t0w=t0w, t0b=t0b,
                t1w=t1w, t1b=t1b, ow=ow, ob=ob)


def pack_params(params):
    """Fold emb@W0^T[:20] and pack everything into two resident VMEM slabs.

    Call ONCE per parameter set (hoisted out of the per-forward hot path).
    """
    # First-layer block (40, 72): [A (40,26) pad->32 | W0_delta^T (40,20) pad->40]
    fused = (params["emb"] @ params["t0w"][:N_EMB_DIM, :]).T               # (40, 26)
    w_first = jnp.zeros((N_HID, K_FIRST), jnp.float32)
    w_first = w_first.at[:, :N_SYMBOL].set(fused)
    w_first = w_first.at[:, OH_PAD:OH_PAD + N_DELTA_HID_DIM].set(
        params["t0w"][N_EMB_DIM:, :].T)

    w_pack = jnp.zeros((W_PACK_ROWS, K_FIRST), jnp.float32)                # (112, 72)
    w_pack = w_pack.at[0:N_HID, :].set(w_first)
    w_pack = w_pack.at[N_HID:2 * N_HID, 0:N_HID].set(params["t1w"].T)
    w_pack = w_pack.at[2 * N_HID:2 * N_HID + N_SYMBOL, 0:N_HID].set(params["ow"].T)

    b_pack = jnp.zeros((B_PACK_ROWS, 1), jnp.float32)                      # (192, 1)
    b_pack = b_pack.at[0:N_DELTA_HID_DIM, 0].set(params["dw"][0])
    b_pack = b_pack.at[N_HID:N_HID + N_DELTA_HID_DIM, 0].set(params["db"][0])
    b_pack = b_pack.at[2 * N_HID:3 * N_HID, 0].set(params["t0b"][0])
    b_pack = b_pack.at[3 * N_HID:4 * N_HID, 0].set(params["t1b"][0])
    b_pack = b_pack.at[4 * N_HID:4 * N_HID + N_SYMBOL, 0].set(params["ob"][0])
    b_pack = b_pack.at[4 * N_HID + N_SYMBOL:4 * N_HID + OUT_PAD, 0].set(NEG_BIG)
    return w_pack, b_pack


def _choose_bm(batch, block_b):
    """Batch (lane) tile: multiple of 128, as large as allowed, >=2 tiles when big."""
    cap = max(128, _round_up(block_b, 128))       # user cap, lane-aligned
    bp = _round_up(max(batch, 1), 128)            # lane-aligned batch
    if bp <= cap:
        # Single tile covers the batch; if it is big enough, split in two so
        # v7x's second TensorCore gets work (each half stays >= 1024).
        if bp >= 2048:
            return _round_up(_cdiv(bp, 2), 128)
        return bp
    # Multiple tiles: balance sizes so there is no tiny trailing tile.
    n_tiles = _cdiv(bp, cap)
    return _round_up(_cdiv(bp, n_tiles), 128)


def net_forward(packed, c_idx, delta, *, block_b=2048):
    """Forward pass. `packed` is the result of pack_params(params)."""
    w_pack, b_pack = packed
    B = c_idx.shape[0]
    bm = _choose_bm(B, block_b)
    Bp = _round_up(B, bm)

    # Batch-in-lanes inputs: contiguous (1, Bp) rows -> contiguous HBM->VMEM DMAs.
    cidx2d = jnp.zeros((1, Bp), jnp.int32).at[0, :B].set(c_idx.astype(jnp.int32))
    delta2d = jnp.zeros((1, Bp), jnp.float32).at[0, :B].set(delta.astype(jnp.float32))

    vmem_limit = (64 * 1024 * 1024) if bm >= 4096 else None

    out = pl.pallas_call(
        _net_kernel,
        out_shape=jax.ShapeDtypeStruct((N_SYMBOL, Bp), jnp.float32),
        grid_spec=pltpu.PrefetchScalarGridSpec(
            num_scalar_prefetch=0,
            grid=(Bp // bm,),
            in_specs=[
                pl.BlockSpec((1, bm), lambda i: (0, i)),           # c_idx tile
                pl.BlockSpec((1, bm), lambda i: (0, i)),           # delta tile
                pl.BlockSpec(w_pack.shape, lambda i: (0, 0)),      # resident weights
                pl.BlockSpec(b_pack.shape, lambda i: (0, 0)),      # resident biases
            ],
            out_specs=pl.BlockSpec((N_SYMBOL, bm), lambda i: (0, i)),
        ),
        compiler_params=pltpu.CompilerParams(
            dimension_semantics=("parallel",),      # v7x: shard batch tiles across TCs
            vmem_limit_bytes=vmem_limit),
    )(cidx2d, delta2d, w_pack, b_pack)

    # Undo the batch-in-lanes transpose and drop batch padding (cheap XLA ops).
    return out[:, :B].T


def net_forward_ref(params, c_idx, delta):
    """Pure-JAX reference of the PyTorch forward."""
    emb_out = params["emb"][c_idx]
    delta_out = jax.nn.relu(delta.reshape(-1, 1) @ params["dw"] + params["db"])
    x = jnp.concatenate([emb_out, delta_out], axis=1)
    x = jax.nn.relu(x @ params["t0w"] + params["t0b"])
    x = jax.nn.relu(x @ params["t1w"] + params["t1b"])
    logits = x @ params["ow"] + params["ob"]
    return jax.nn.log_softmax(logits, axis=1)


if __name__ == "__main__":
    key = jax.random.PRNGKey(0)
    kp, ki, kd = jax.random.split(key, 3)

    params = init_params(kp)
    packed = pack_params(params)     # packed once, outside the per-call hot path

    # small deterministic inputs
    B = 8
    c_idx = jax.random.randint(ki, (B,), 0, N_SYMBOL, dtype=jnp.int32)
    delta = jax.random.normal(kd, (B,), jnp.float32)

    out = jax.block_until_ready(net_forward(packed, c_idx, delta))
    ref = net_forward_ref(params, c_idx, delta)
    assert out.shape == (B, N_SYMBOL)
    assert jnp.allclose(out, ref, atol=1e-5, rtol=1e-5), "mismatch vs reference (B=8)"

    # second check: exercise the multi-tile grid + batch padding path (grid > 1)
    B2 = 300
    ki2, kd2 = jax.random.split(jax.random.PRNGKey(1))
    c_idx2 = jax.random.randint(ki2, (B2,), 0, N_SYMBOL, dtype=jnp.int32)
    delta2 = jax.random.normal(kd2, (B2,), jnp.float32)
    out2 = jax.block_until_ready(net_forward(packed, c_idx2, delta2, block_b=256))
    ref2 = net_forward_ref(params, c_idx2, delta2)
    assert out2.shape == (B2, N_SYMBOL)
    assert jnp.allclose(out2, ref2, atol=1e-5, rtol=1e-5), "mismatch vs reference (B=300)"

    print("KERNEL_OK")
</pallas_src>

<mosaic_0001>
module attributes {stable_mosaic.version = 11 : i64} {
  func.func @_net_kernel(%arg0: i32, %arg1: memref<1x128xi32, #tpu.memory_space<vmem>>, %arg2: memref<1x128xf32, #tpu.memory_space<vmem>>, %arg3: memref<112x72xf32, #tpu.memory_space<vmem>>, %arg4: memref<192x1xf32, #tpu.memory_space<vmem>>, %arg5: memref<26x128xf32, #tpu.memory_space<vmem>>) attributes {dimension_semantics = [#tpu.dimension_semantics<parallel>], iteration_bounds = array<i64: 1>, scalar_prefetch = 0 : i64, scratch_operands = 0 : i64, tpu.core_type = #tpu.core_type<tc>, window_params = [{transform_indices = @transform_0, window_bounds = array<i64: 1, 128>}, {transform_indices = @transform_1, window_bounds = array<i64: 1, 128>}, {pipeline_mode = #tpu.pipeline_mode<synchronous>, transform_indices = @transform_2, window_bounds = array<i64: 112, 72>}, {pipeline_mode = #tpu.pipeline_mode<synchronous>, transform_indices = @transform_3, window_bounds = array<i64: 192, 1>}, {transform_indices = @transform_4, window_bounds = array<i64: 26, 128>}]} {
    %0 = tpu.iota {dimensions = array<i32: 0>} : vector<32x128xi32>
    %c0 = arith.constant 0 : index
    %c0_0 = arith.constant 0 : index
    %1 = vector.load %arg1[%c0, %c0_0] : memref<1x128xi32, #tpu.memory_space<vmem>>, vector<1x128xi32>
    %2 = vector.broadcast %1 : vector<1x128xi32> to vector<32x128xi32>
    %3 = arith.cmpi eq, %0, %2 : vector<32x128xi32>
    %4 = arith.extui %3 : vector<32x128xi1> to vector<32x128xi32>
    %5 = arith.sitofp %4 : vector<32x128xi32> to vector<32x128xf32>
    %c0_1 = arith.constant 0 : index
    %c0_2 = arith.constant 0 : index
    %6 = vector.load %arg4[%c0_1, %c0_2] : memref<192x1xf32, #tpu.memory_space<vmem>>, vector<40x1xf32>
    %c40 = arith.constant 40 : index
    %c0_3 = arith.constant 0 : index
    %7 = vector.load %arg4[%c40, %c0_3] : memref<192x1xf32, #tpu.memory_space<vmem>>, vector<40x1xf32>
    %8 = tpu.iota {dimensions = array<i32: 0>} : vector<40x128xi32>
    %c0_4 = arith.constant 0 : index
    %c0_5 = arith.constant 0 : index
    %9 = vector.load %arg2[%c0_4, %c0_5] : memref<1x128xf32, #tpu.memory_space<vmem>>, vector<1x128xf32>
    %10 = vector.broadcast %6 : vector<40x1xf32> to vector<40x128xf32>
    %11 = vector.broadcast %9 : vector<1x128xf32> to vector<40x128xf32>
    %12 = arith.mulf %10, %11 : vector<40x128xf32>
    %13 = vector.broadcast %7 : vector<40x1xf32> to vector<40x128xf32>
    %14 = arith.addf %12, %13 : vector<40x128xf32>
    %c20_i32 = arith.constant 20 : i32
    %15 = vector.broadcast %c20_i32 : i32 to vector<40x128xi32>
    %16 = arith.cmpi slt, %8, %15 : vector<40x128xi32>
    %cst = arith.constant 0.000000e+00 : f32
    %17 = vector.broadcast %cst : f32 to vector<40x128xf32>
    %18 = arith.maximumf %14, %17 : vector<40x128xf32>
    %cst_6 = arith.constant 0.000000e+00 : f32
    %19 = vector.broadcast %cst_6 : f32 to vector<40x128xf32>
    %20 = arith.select %16, %18, %19 : vector<40x128xi1>, vector<40x128xf32>
    %21 = tpu.concatenate %5, %20 in 0 : vector<32x128xf32>, vector<40x128xf32> -> vector<72x128xf32>
    %c0_7 = arith.constant 0 : index
    %c0_8 = arith.constant 0 : index
    %22 = vector.load %arg3[%c0_7, %c0_8] : memref<112x72xf32, #tpu.memory_space<vmem>>, vector<40x72xf32>
    %cst_9 = arith.constant dense<0.000000e+00> : vector<40x128xf32>
    %23 = tpu.matmul %22, %21, %cst_9 {dimension_numbers = #tpu.dot_dimension_numbers<[1], [0], [0], [1], [0, 0, 1, 1], [], []>} : vector<40x72xf32>, vector<72x128xf32>, vector<40x128xf32> -> vector<40x128xf32>
    %c80 = arith.constant 80 : index
    %c0_10 = arith.constant 0 : index
    %24 = vector.load %arg4[%c80, %c0_10] : memref<192x1xf32, #tpu.memory_space<vmem>>, vector<40x1xf32>
    %25 = vector.broadcast %24 : vector<40x1xf32> to vector<40x128xf32>
    %26 = arith.addf %23, %25 : vector<40x128xf32>
    %cst_11 = arith.constant 0.000000e+00 : f32
    %27 = vector.broadcast %cst_11 : f32 to vector<40x128xf32>
    %28 = arith.maximumf %26, %27 : vector<40x128xf32>
    %c40_12 = arith.constant 40 : index
    %c0_13 = arith.constant 0 : index
    %29 = vector.load %arg3[%c40_12, %c0_13] : memref<112x72xf32, #tpu.memory_space<vmem>>, vector<40x40xf32>
    %cst_14 = arith.constant dense<0.000000e+00> : vector<40x128xf32>
    %30 = tpu.matmul %29, %28, %cst_14 {dimension_numbers = #tpu.dot_dimension_numbers<[1], [0], [0], [1], [0, 0, 1, 1], [], []>} : vector<40x40xf32>, vector<40x128xf32>, vector<40x128xf32> -> vector<40x128xf32>
    %c120 = arith.constant 120 : index
    %c0_15 = arith.constant 0 : index
    %31 = vector.load %arg4[%c120, %c0_15] : memref<192x1xf32, #tpu.memory_space<vmem>>, vector<40x1xf32>
    %32 = vector.broadcast %31 : vector<40x1xf32> to vector<40x128xf32>
    %33 = arith.addf %30, %32 : vector<40x128xf32>
    %cst_16 = arith.constant 0.000000e+00 : f32
    %34 = vector.broadcast %cst_16 : f32 to vector<40x128xf32>
    %35 = arith.maximumf %33, %34 : vector<40x128xf32>
    %c80_17 = arith.constant 80 : index
    %c0_18 = arith.constant 0 : index
    %36 = vector.load %arg3[%c80_17, %c0_18] : memref<112x72xf32, #tpu.memory_space<vmem>>, vector<32x40xf32>
    %cst_19 = arith.constant dense<0.000000e+00> : vector<32x128xf32>
    %37 = tpu.matmul %36, %35, %cst_19 {dimension_numbers = #tpu.dot_dimension_numbers<[1], [0], [0], [1], [0, 0, 1, 1], [], []>} : vector<32x40xf32>, vector<40x128xf32>, vector<32x128xf32> -> vector<32x128xf32>
    %c160 = arith.constant 160 : index
    %c0_20 = arith.constant 0 : index
    %38 = vector.load %arg4[%c160, %c0_20] : memref<192x1xf32, #tpu.memory_space<vmem>>, vector<32x1xf32>
    %39 = vector.broadcast %38 : vector<32x1xf32> to vector<32x128xf32>
    %40 = arith.addf %37, %39 : vector<32x128xf32>
    %cst_21 = arith.constant dense<0xFF800000> : vector<128xf32>
    %41 = vector.multi_reduction <maximumf>, %40, %cst_21 [0] : vector<32x128xf32> to vector<128xf32>
    %42 = vector.shape_cast %41 : vector<128xf32> to vector<1x128xf32>
    %43 = vector.broadcast %42 : vector<1x128xf32> to vector<32x128xf32>
    %44 = arith.subf %40, %43 : vector<32x128xf32>
    %45 = math.exp %44 : vector<32x128xf32>
    %cst_22 = arith.constant dense<0.000000e+00> : vector<128xf32>
    %46 = vector.multi_reduction <add>, %45, %cst_22 [0] : vector<32x128xf32> to vector<128xf32>
    %47 = vector.shape_cast %46 : vector<128xf32> to vector<1x128xf32>
    %48 = math.log %47 : vector<1x128xf32>
    %49 = vector.extract_strided_slice %44 {offsets = [0, 0], sizes = [26, 128], strides = [1, 1]} : vector<32x128xf32> to vector<26x128xf32>
    %50 = vector.broadcast %48 : vector<1x128xf32> to vector<26x128xf32>
    %51 = arith.subf %49, %50 : vector<26x128xf32>
    %c0_23 = arith.constant 0 : index
    %c0_24 = arith.constant 0 : index
    %52 = vector.load %arg5[%c0_23, %c0_24] : memref<26x128xf32, #tpu.memory_space<vmem>>, vector<26x128xf32>
    tpu.vector_store %arg5[%c0_23, %c0_24], %51 {strides = array<i32>} : memref<26x128xf32, #tpu.memory_space<vmem>>, vector<26x128xf32>,
    return
  }
  func.func @transform_0(%arg0: i32) -> (i32, i32) {
    %c0_i32 = arith.constant 0 : i32
    %c0_i32_0 = arith.constant 0 : i32
    return %c0_i32, %arg0 : i32, i32
  }
  func.func @transform_1(%arg0: i32) -> (i32, i32) {
    %c0_i32 = arith.constant 0 : i32
    %c0_i32_0 = arith.constant 0 : i32
    return %c0_i32, %arg0 : i32, i32
  }
  func.func @transform_2(%arg0: i32) -> (i32, i32) {
    %c0_i32 = arith.constant 0 : i32
    %c0_i32_0 = arith.constant 0 : i32
    %c0_i32_1 = arith.constant 0 : i32
    return %c0_i32, %c0_i32_0 : i32, i32
  }
  func.func @transform_3(%arg0: i32) -> (i32, i32) {
    %c0_i32 = arith.constant 0 : i32
    %c0_i32_0 = arith.constant 0 : i32
    %c0_i32_1 = arith.constant 0 : i32
    return %c0_i32, %c0_i32_0 : i32, i32
  }
  func.func @transform_4(%arg0: i32) -> (i32, i32) {
    %c0_i32 = arith.constant 0 : i32
    %c0_i32_0 = arith.constant 0 : i32
    return %c0_i32, %arg0 : i32, i32
  }
}

</mosaic_0001>

<bundles_post_ra>
// kernel: tpu_custom_call.1
= control target key start
LH: loop header
LB: loop body
LE: loop exit
PB: predicated region body
PF: predicated region fallthrough
CT: control target
= control target key end

     0   :  { %v18_v2 = vlaneseq  ;;  %v799_v3 = vmov 0   ;;  %v800_v8 = vmov 0.0|0.0   ;;  %s992_s0 = inlined_call_operand.vmem [shape: s32[1,128], index: 0, kind: input, shape index: {}]   ;;  %s993_s1 = inlined_call_operand.vmem [shape: f32[1,128], index: 1, kind: input, shape index: {}]   ;;  %s994_s2 = inlined_call_operand.vmem [shape: f32[112,72], index: 2, kind: input, shape index: {}]   ;;  %s995_s3 = inlined_call_operand.vmem [shape: f32[192,1], index: 3, kind: input, shape index: {}]   ;;  %s996_s4 = inlined_call_operand.hbm [shape: f32[26,128], index: 4, kind: output, shape index: {}]  }
   0x1   :  { %v45_v0 = vld [vmem:[%s995_s3 + $0x28] sm:$0xff]  ;;  %v40_v1 = vld [vmem:[%s995_s3] sm:$0xff]  ;;  %764 = vset.pattern.permute.xlu1 %v799_v3  ;;  %763 = vset.pattern.permute.xlu0 %v799_v3  ;;  %v46_v5 = vld [vmem:[%s995_s3 + $0x30] sm:$0xff] }
   0x2   :  { %90 = vperm.xlu1 %764, %v45_v0   ;;  %54 = vperm.xlu0 %763, %v40_v1   ;;  %v19_v4 = vshrl.u32 %v18_v2, 7  ;;  %v41_v6 = vld [vmem:[%s995_s3 + $0x8] sm:$0xff]  ;;  %v47_v9 = vld [vmem:[%s995_s3 + $0x38] sm:$0xff]  ;;  %v42_v12 = vld [vmem:[%s995_s3 + $0x10] sm:$0xff] }
   0x3   :  { %732 = vmatprep.subr.bf16.mxu0 %v800_v8  ;;  %741 = vmatprep.subr.bf16.mxu1 %v800_v8  ;;  %v606_v13 = vld [vmem:[%s992_s0] ss:$0 sm:$0xff] }
   0x4   :  { %v20_v7 = vadd.s32 8, %v19_v4  ;;  %v849_v10 = vadd.s32 16, %v19_v4  ;;  %v22_v11 = vadd.s32 24, %v19_v4 }
   0x6   :  { %95 = vperm.xlu1 %764, %v46_v5   ;;  %59 = vperm.xlu0 %763, %v41_v6  }
   0x7   :  { %9 = vsyncpa [#allocation3], 0  ;;  %vm28_vm0 = vcmp.eq.s32.totalorder %v19_v4, %v606_v13  ;;  %vm29_vm1 = vcmp.eq.s32.totalorder %v20_v7, %v606_v13  ;;  %vm30_vm3 = vcmp.eq.s32.totalorder %v849_v10, %v606_v13  ;;  %vm31_vm4 = vcmp.eq.s32.totalorder %v22_v11, %v606_v13  ;;  %v139_v14 = vld [vmem:[%s995_s3 + $0x58] sm:$0xff]  ;;  %v138_v15 = vld [vmem:[%s995_s3 + $0x50] sm:$0xff] }
   0x8   :  { %vm733_vm2 = vmpackc.low %vm29_vm1, %vm28_vm0  ;;  %v801_v16 = vmov 1.0|1.0   ;;  %v141_v17 = vld [vmem:[%s995_s3 + $0x68] sm:$0xff]  ;;  %v140_v18 = vld [vmem:[%s995_s3 + $0x60] sm:$0xff]  ;;  %vm802_vm6 = vmmov 0   ;;  %v803_v21 = vmov 0.0  }
   0x9   :  { %734 = vmatpush3.bf16.msk.msra.mxu0 %vm733_vm2, %v801_v16  ;;  %vm736_vm5 = vmpackc.low %vm31_vm4, %vm30_vm3  ;;  %v284_v19 = vld [vmem:[%s995_s3 + $0x78] sm:$0xff]  ;;  %v142_v20 = vld [vmem:[%s995_s3 + $0x70] sm:$0xff]  ;;  %676 = vmatprep.mubr.msk.f32.mxu0 %vm802_vm6, %v803_v21  ;;  %vm120_vm7 = vcmp.lt.s32.totalorder %v849_v10, 20  ;;  %vm168_vm8 = vcmask 588800   ;;  %vm314_vm9 = vcmask 326656  }
   0xa   :  { %100 = vperm.xlu1 %764, %v47_v9   ;;  %64 = vperm.xlu0 %763, %v42_v12   ;;  %v286_v22 = vld [vmem:[%s995_s3 + $0x88] sm:$0xff]  ;;  %v285_v23 = vld [vmem:[%s995_s3 + $0x80] sm:$0xff]  ;;  %v288_v24 = vld [vmem:[%s995_s3 + $0x98] sm:$0xff] }
   0xb   :  { %735 = vmatprep.subr.bf16.mxu0 %v800_v8  ;;  %701 = vmatprep.mubr.msk.f32.mxu1 %vm802_vm6, %v803_v21  ;;  %v287_v25 = vld [vmem:[%s995_s3 + $0x90] sm:$0xff]  ;;  %v430_v26 = vld [vmem:[%s995_s3 + $0xa8] sm:$0xff]  ;;  %v429_v27 = vld [vmem:[%s995_s3 + $0xa0] sm:$0xff] }
   0xc   :  { %v432_v28 = vld [vmem:[%s995_s3 + $0xb8] sm:$0xff]  ;;  %v431_v29 = vld [vmem:[%s995_s3 + $0xb0] sm:$0xff]  ;;  %v611_v30 = vld [vmem:[%s993_s1] ss:$0 sm:$0xff] }
   0xd   :  { %737 = vmatpush3.bf16.msk.msra.mxu0 %vm736_vm5, %v801_v16  ;;  %v133_v47 = vld [vmem:[%s994_s2] sm:$0xff]  ;;  %v134_v48 = vld [vmem:[%s994_s2 + $0x8] sm:$0xff]  ;;  %v135_v49 = vld [vmem:[%s994_s2 + $0x10] sm:$0xff] }
   0xe   :  { %150 = vperm.xlu1 %764, %v139_v14   ;;  %145 = vperm.xlu0 %763, %v138_v15   ;;  %v136_v50 = vld [vmem:[%s994_s2 + $0x18] sm:$0xff]  ;;  %v137_v51 = vld [vmem:[%s994_s2 + $0x20] sm:$0xff]  ;;  %v279_v16 = vld [vmem:[%s994_s2 + $0x28] sm:$0xff] }
   0xf   :  { %738 = vmatprep.subr.bf16.mxu0 %v800_v8 }
  0x12   :  { %160 = vperm.xlu1 %764, %v141_v17   ;;  %155 = vperm.xlu0 %763, %v140_v18   ;;  %v281_v17 = vld [vmem:[%s994_s2 + $0x38] sm:$0xff]  ;;  %v282_v18 = vld [vmem:[%s994_s2 + $0x40] sm:$0xff] }
  0x16   :  { %291 = vperm.xlu1 %764, %v284_v19   ;;  %165 = vperm.xlu0 %763, %v142_v20   ;;  %v283_v19 = vld [vmem:[%s994_s2 + $0x48] sm:$0xff]  ;;  %v425_v20 = vld [vmem:[%s994_s2 + $0x50] sm:$0xff] }
  0x1a   :  { %301 = vperm.xlu1 %764, %v286_v22   ;;  %296 = vperm.xlu0 %763, %v285_v23  }
  0x1e   :  { %311 = vperm.xlu1 %764, %v288_v24   ;;  %306 = vperm.xlu0 %763, %v287_v25  }
  0x22   :  { %440 = vperm.xlu1 %764, %v430_v26   ;;  %435 = vperm.xlu0 %763, %v429_v27  }
  0x26   :  { %450 = vperm.xlu1 %764, %v432_v28   ;;  %445 = vperm.xlu0 %763, %v431_v29  }
  0x81   :  { %v91_v31 = vpop.permute.xlu1 %90  ;;  %v55_v32 = vpop.permute.xlu0 %54 }
  0x82   :  { %v83_v33 = vmul.f32 %v611_v30, %v55_v32 }
  0x84   :  { %v113_v36 = vadd.f32 %v91_v31, %v83_v33 }
  0x85   :  { %v96_v34 = vpop.permute.xlu1 %95  ;;  %v60_v35 = vpop.permute.xlu0 %59 }
  0x86   :  { %v84_v37 = vmul.f32 %v611_v30, %v60_v35  ;;  %v123_v40 = vmax.f32 %v113_v36, 0.0 }
  0x88   :  { %v114_v38 = vadd.f32 %v96_v34, %v84_v37 }
  0x89   :  { %v65_v39 = vpop.permute.xlu0 %64  ;;  %v101_v43 = vpop.permute.xlu1 %100 }
  0x8a   :  { %v124_v41 = vmax.f32 %v114_v38, 0.0  ;;  %v85_v42 = vmul.f32 %v611_v30, %v65_v39 }
  0x8c   :  { %v115_v44 = vadd.f32 %v101_v43, %v85_v42  ;;  %v739_v45 = vpack.c.bf16 %v124_v41, %v123_v40 }
  0x8d   :  { %v146_v54 = vpop.permute.xlu0 %145  ;;  %v151_v56 = vpop.permute.xlu1 %150 }
  0x8e   :  { %740 = vmatpush3.bf16.msra.mxu0 %v739_v45  ;;  %v125_v46 = vmax.f32 %v115_v44, 0.0 }
  0x8f   :  { %674 = vmatprep.subr.mxu0 %v803_v21 }
  0x91   :  { %v156_v1 = vpop.permute.xlu0 %155  ;;  %v161_v3 = vpop.permute.xlu1 %160 }
  0x92   :  { %675 = vmatpush3.msk.msra.mxu0 %vm120_vm7, %v125_v46 }
  0x93   :  { %677 = vmatmul.mubr.msk.f32.vlgmr.msra.gmra.mrb[0].mxu0 %vm168_vm8, %v133_v47 }
  0x94   :  { %679 = vmatprep.mubr.msk.f32.mxu0 %vm802_vm6, %v803_v21 }
  0x95   :  { %v166_v10 = vpop.permute.xlu0 %165  ;;  %v292_v24 = vpop.permute.xlu1 %291 }
  0x97   :  { %680 = vmatmul.mubr.msk.f32.gmra.mrb[2].mxu0 %vm168_vm8, %v134_v48  ;;  %v426_v48 = vld [vmem:[%s994_s2 + $0x58] sm:$0xff] }
  0x98   :  { %682 = vmatprep.mubr.msk.f32.mxu0 %vm802_vm6, %v803_v21 }
  0x99   :  { %v297_v26 = vpop.permute.xlu0 %296  ;;  %v302_v34 = vpop.permute.xlu1 %301 }
  0x9b   :  { %683 = vmatmul.mubr.msk.f32.gmra.mrb[4].mxu0 %vm168_vm8, %v135_v49  ;;  %v427_v49 = vld [vmem:[%s994_s2 + $0x60] sm:$0xff] }
  0x9c   :  { %685 = vmatprep.mubr.msk.f32.mxu0 %vm802_vm6, %v803_v21 }
  0x9d   :  { %v307_v36 = vpop.permute.xlu0 %306  ;;  %v312_v42 = vpop.permute.xlu1 %311 }
  0x9f   :  { %686 = vmatmul.mubr.msk.f32.gmra.mrb[6].mxu0 %vm168_vm8, %v136_v50  ;;  %v428_v50 = vld [vmem:[%s994_s2 + $0x68] sm:$0xff] }
  0xa0   :  { %688 = vmatprep.mubr.msk.f32.mxu0 %vm802_vm6, %v803_v21 }
  0xa3   :  { %689 = vmatmul.mubr.msk.f32.gmra.mrb[8].mxu0 %vm168_vm8, %v137_v51  ;;  %v441_v51 = vpop.permute.xlu1 %440 }
 0x166   :  { %v250_v52 = vpop.f32.mrb[0].mxu0 }
 0x167   :  { %v678_v53 = vpop.f32.mrb[1].mxu0  ;;  %v251_v55 = vadd.f32 %v250_v52, %v146_v54  ;;  %v436_v52 = vpop.permute.xlu0 %435 }
 0x169   :  { %v274_v60 = vmax.f32 %v251_v55, 0.0 }
 0x16a   :  { %v255_v57 = vpop.f32.mrb[2].mxu0 }
 0x16b   :  { %v256_v58 = vadd.f32 %v255_v57, %v151_v56  ;;  %v681_v59 = vpop.f32.mrb[3].mxu0  ;;  %v451_v57 = vpop.permute.xlu1 %450 }
 0x16d   :  { %v275_v61 = vmax.f32 %v256_v58, 0.0 }
 0x16e   :  { %v260_v62 = vpop.f32.mrb[4].mxu0 }
 0x16f   :  { %v684_v63 = vpop.f32.mrb[5].mxu0  ;;  %v742_v0 = vpack.c.bf16 %v275_v61, %v274_v60  ;;  %v261_v2 = vadd.f32 %v260_v62, %v156_v1  ;;  %v446_v60 = vpop.permute.xlu0 %445 }
 0x171   :  { %743 = vmatpush3.bf16.msra.mxu1 %v742_v0  ;;  %v276_v7 = vmax.f32 %v261_v2, 0.0 }
 0x172   :  { %v265_v4 = vpop.f32.mrb[6].mxu0  ;;  %744 = vmatprep.subr.bf16.mxu1 %v800_v8  ;;  %v280_v8 = vld [vmem:[%s994_s2 + $0x30] sm:$0xff]  ;;  %s804_s2 = smov [#allocation2]  }
 0x173   :  { %v266_v5 = vadd.f32 %v265_v4, %v161_v3  ;;  %v687_v6 = vpop.f32.mrb[7].mxu0  ;;  %s595_s5 = sshll.u32 %s804_s2, 4  ;;  %s596_s5 = int_to_ptr.vmem [resolvable:$true] %s595_s5 }
 0x174   :  { %s775_s1 = scalar_lea.vmem %s596_s5, 512  ;;  %p780_p1 = scmp.lt.s32.totalorder %s596_s5, %s596_s5 }
 0x175   :  { %v277_v9 = vmax.f32 %v266_v5, 0.0  ;;  %p776_p0 = scmp.ne.s32.totalorder %s596_s5, %s775_s1  ;;  %p781_p2 = scmp.lt.s32.totalorder %s775_s1, %s775_s1 }
 0x176   :  { %v270_v11 = vpop.f32.mrb[8].mxu0 }
 0x177   :  { %v745_v12 = vpack.c.bf16 %v277_v9, %v276_v7  ;;  %v271_v13 = vadd.f32 %v270_v11, %v166_v10  ;;  %v690_v14 = vpop.f32.mrb[9].mxu0  ;;  %p782_p3 = por %p781_p2, %p780_p1 }
 0x179   :  { %746 = vmatpush3.bf16.msra.mxu1 %v745_v12  ;;  %v278_v15 = vmax.f32 %v271_v13, 0.0  ;;  %p783_p4 = pnand %p782_p3, %p776_p0 }
 0x17a   :  { %699 = vmatprep.subr.mxu1 %v803_v21 }
 0x17d   :  { %700 = vmatpush3.msra.mxu1 %v278_v15 }
 0x17e   :  { %702 = vmatmul.mubr.msk.f32.vlgmr.msra.gmra.mrb[0].mxu1 %vm314_vm9, %v279_v16 }
 0x17f   :  { %704 = vmatprep.mubr.msk.f32.mxu1 %vm802_vm6, %v803_v21 }
 0x182   :  { %705 = vmatmul.mubr.msk.f32.gmra.mrb[2].mxu1 %vm314_vm9, %v280_v8 }
 0x183   :  { %707 = vmatprep.mubr.msk.f32.mxu1 %vm802_vm6, %v803_v21 }
 0x186   :  { %708 = vmatmul.mubr.msk.f32.gmra.mrb[4].mxu1 %vm314_vm9, %v281_v17 }
 0x187   :  { %710 = vmatprep.mubr.msk.f32.mxu1 %vm802_vm6, %v803_v21 }
 0x18a   :  { %711 = vmatmul.mubr.msk.f32.gmra.mrb[6].mxu1 %vm314_vm9, %v282_v18 }
 0x18b   :  { %713 = vmatprep.mubr.msk.f32.mxu1 %vm802_vm6, %v803_v21 }
 0x18e   :  { %714 = vmatmul.mubr.msk.f32.gmra.mrb[8].mxu1 %vm314_vm9, %v283_v19 }
 0x18f   :  { %726 = vmatprep.mubr.msk.f32.mxu1 %vm314_vm9, %v425_v20 }
 0x251   :  { %v396_v22 = vpop.f32.mrb[0].mxu1 }
 0x252   :  { %v703_v23 = vpop.f32.mrb[1].mxu1  ;;  %v397_v25 = vadd.f32 %v396_v22, %v292_v24 }
 0x254   :  { %v420_v29 = vmax.f32 %v397_v25, 0.0 }
 0x255   :  { %v401_v27 = vpop.f32.mrb[2].mxu1 }
 0x256   :  { %v402_v28 = vadd.f32 %v401_v27, %v297_v26  ;;  %v706_v21 = vpop.f32.mrb[3].mxu1 }
 0x258   :  { %v421_v30 = vmax.f32 %v402_v28, 0.0 }
 0x259   :  { %v406_v31 = vpop.f32.mrb[4].mxu1 }
 0x25a   :  { %v747_v32 = vpack.c.bf16 %v421_v30, %v420_v29  ;;  %v709_v33 = vpop.f32.mrb[5].mxu1  ;;  %v407_v35 = vadd.f32 %v406_v31, %v302_v34 }
 0x25c   :  { %748 = vmatprep.subr.bf16.mxu1 %v747_v32  ;;  %v422_v40 = vmax.f32 %v407_v35, 0.0 }
 0x25d   :  { %v411_v37 = vpop.f32.mrb[6].mxu1  ;;  %750 = vmatpush3.bf16.msra.mxu1 %v747_v32 }
 0x25e   :  { %v412_v38 = vadd.f32 %v411_v37, %v307_v36  ;;  %v712_v39 = vpop.f32.mrb[7].mxu1 }
 0x260   :  { %v423_v41 = vmax.f32 %v412_v38, 0.0 }
 0x261   :  { %v416_v43 = vpop.f32.mrb[8].mxu1 }
 0x262   :  { %v751_v44 = vpack.c.bf16 %v423_v41, %v422_v40  ;;  %v417_v45 = vadd.f32 %v416_v43, %v312_v42  ;;  %v715_v46 = vpop.f32.mrb[9].mxu1 }
 0x264   :  { %v424_v47 = vmax.f32 %v417_v45, 0.0  ;;  %752 = vmatprep.subr.bf16.mxu1 %v751_v44 }
 0x265   :  { %754 = vmatpush3.bf16.msra.mxu1 %v751_v44 }
 0x266   :  { %724 = vmatprep.subr.mxu1 %v424_v47 }
 0x269   :  { %725 = vmatpush3.msra.mxu1 %v424_v47 }
 0x26a   :  { %727 = vmatmul.mubr.msk.f32.vlgmr.msra.gmra.mrb[10].mxu1 %vm314_vm9, %v426_v48 }
 0x26b   :  { %729 = vmatprep.mubr.msk.f32.mxu1 %vm314_vm9, %v427_v49 }
 0x26e   :  { %730 = vmatmul.mubr.msk.f32.gmra.mrb[12].mxu1 %vm314_vm9, %v428_v50 }
 0x33d   :  { %v728_v53 = vpop.f32.mrb[10].mxu1 }
 0x33e   :  { %v537_v54 = vadd.f32 %v728_v53, %v441_v51  ;;  %v531_v55 = vpop.f32.mrb[11].mxu1 }
 0x33f   :  { %v532_v56 = vadd.f32 %v531_v55, %v436_v52 }
 0x341   :  { %v550_v58 = vmax.f32 %v532_v56, %v537_v54  ;;  %v731_v59 = vpop.f32.mrb[12].mxu1 }
 0x342   :  { %v547_v61 = vadd.f32 %v731_v59, %v451_v57  ;;  %v541_v62 = vpop.f32.mrb[13].mxu1 }
 0x343   :  { %v542_v63 = vadd.f32 %v541_v62, %v446_v60 }
 0x345   :  { %v551_v0 = vmax.f32 %v542_v63, %v547_v61 }
 0x347   :  { %v552_v1 = vmax.f32 %v550_v58, %v551_v0 }
 0x349   :  { %v553_v2 = vrot.slane %v552_v1, 4 }
 0x34b   :  { %v554_v3 = vmax.f32 %v552_v1, %v553_v2 }
 0x34d   :  { %v555_v4 = vrot.slane %v554_v3, 2 }
 0x34f   :  { %v556_v5 = vmax.f32 %v554_v3, %v555_v4 }
 0x351   :  { %v557_v6 = vrot.slane %v556_v5, 1 }
 0x353   :  { %v558_v7 = vmax.f32 %v556_v5, %v557_v6 }
 0x355   :  { %v559_v9 = vsub.f32 %v532_v56, %v558_v7  ;;  %v560_v10 = vsub.f32 %v537_v54, %v558_v7  ;;  %v561_v11 = vsub.f32 %v542_v63, %v558_v7  ;;  %v562_v12 = vsub.f32 %v547_v61, %v558_v7 }
 0x357   :  { %v563_v13 = vmul.f32 1.442695, %v559_v9  ;;  %v565_v14 = vmul.f32 1.442695, %v560_v10  ;;  %v567_v15 = vmul.f32 1.442695, %v561_v11 }
 0x358   :  { %v569_v16 = vmul.f32 1.442695, %v562_v12 }
 0x359   :  { %765 = vpow2.f32 %v563_v13 }
 0x35a   :  { %767 = vpow2.f32 %v565_v14 }
 0x35b   :  { %769 = vpow2.f32 %v567_v15 }
 0x35c   :  { %771 = vpow2.f32 %v569_v16 }
 0x363   :  { %v766_v8 = vpop.eup %765 }
 0x364   :  { %v768_v17 = vpop.eup %767 }
 0x365   :  { %v571_v18 = vadd.f32 %v768_v17, %v766_v8  ;;  %v770_v19 = vpop.eup %769 }
 0x366   :  { %v772_v22 = vpop.eup %771 }
 0x367   :  { %v572_v20 = vadd.f32 %v770_v19, %v571_v18 }
 0x369   :  { %v573_v23 = vadd.f32 %v772_v22, %v572_v20 }
 0x36b   :  { %v574_v24 = vrot.slane %v573_v23, 4 }
 0x36d   :  { %v575_v25 = vadd.f32 %v574_v24, %v573_v23 }
 0x36f   :  { %v576_v26 = vrot.slane %v575_v25, 2 }
 0x371   :  { %v577_v27 = vadd.f32 %v576_v26, %v575_v25 }
 0x373   :  { %v578_v28 = vrot.slane %v577_v27, 1 }
 0x375   :  { %v579_v21 = vadd.f32 %v578_v28, %v577_v27 }
 0x377   :  { %773 = vlog2.f32 %v579_v21 }
 0x381   :  { %v774_v29 = vpop.eup %773 }
 0x382   :  { %v581_v30 = vmul.f32 0.6931472, %v774_v29 }
 0x384   :  { %v584_v31 = vsub.f32 %v561_v11, %v581_v30  ;;  %v582_v32 = vsub.f32 %v559_v9, %v581_v30  ;;  %v583_v33 = vsub.f32 %v560_v10, %v581_v30  ;;  %v585_v34 = vsub.f32 %v562_v12, %v581_v30 }
 0x386   :  { %588 = vst [vmem:[#allocation2 + $0x10] sm:$0xff] %v584_v31  ;;  %586 = vst [vmem:[#allocation2] sm:$0xff] %v582_v32 }
 0x387   :  { %587 = vst [vmem:[#allocation2 + $0x8] sm:$0xff] %v583_v33  ;;  %589 = vst [vmem:[#allocation2 + $0x18] sm:$0x3] %v585_v34 }
 0x388   :  { %786 = shalt.err (!%p783_p4)
}
 0x389   :  { %s787_s0 = scalar_lea.hbm %s996_s4, 512 }
 0x38a   :  { %p788_p5 = scmp.ne.s32.totalorder %s996_s4, %s787_s0  ;;  %p791_p6 = scmp.lt.u32.totalorder %s787_s0, %s996_s4 }
 0x38c   :  { %p793_p7 = pnand %p791_p6, %p788_p5 }
 0x38e   :  { %796 = shalt.err (!%p793_p7)
}
 0x38f   :  { %s805_s11 = smov 128   ;;  %s806_s12 = smov 8  }
 0x390   :  { %601 = dma.vmem_to_hbm [thread:$0]  %s596_s5, 512, %s996_s4, [#allocation3], %s805_s11, %s805_s11, %s806_s12  }
 0x391   :  { %797 = dma.done.wait [#allocation3], 512  }
 0x392   :  { %798 = vsyncadd [#allocation3], 4294966784 }
 0x393   :  { %605 = vsyncpa [#allocation3], 1 }

</bundles_post_ra>
